<compile_context>
chip_gen: v5e
topology: v5e:2x2
jax: 0.10.0
libtpu: 0.0.40
codegen_flags: <defaults>
</compile_context>

<pallas_src>
import functools

import jax
import jax.numpy as jnp
from jax.experimental import pallas as pl
from jax.experimental.pallas import tpu as pltpu

FEATURES_SIZE = 256
N_CLASSES = 1
LANE = 128
SUBLANE = 8
MAX_TILE_B = 2048                      # upper bound on rows per grid step
VMEM_BUDGET_BYTES = 12 * 1024 * 1024   # keep well under every gen's default scoped VMEM


def _round_up(x, m):
    return ((x + m - 1) // m) * m


def _pick_tile(b, candidates, fits=lambda tb: True):
    for tb in candidates:
        if b % tb == 0 and fits(tb):
            return tb
    return None


def init_classifier_params(key, features_size=FEATURES_SIZE, n_classes=N_CLASSES):
    """Deterministic init matching nn.Linear's default U(-1/sqrt(fan_in), 1/sqrt(fan_in))."""
    kw, kb = jax.random.split(key)
    bound = 1.0 / jnp.sqrt(jnp.float32(features_size))
    weight = jax.random.uniform(
        kw, (n_classes, features_size), jnp.float32, -bound, bound
    )
    bias = jax.random.uniform(kb, (n_classes,), jnp.float32, -bound, bound)
    return weight, bias


def prepare_classifier_params(weight, bias, dtype=jnp.float32):
    """Pad PyTorch-style (n_classes, F) weight / (n_classes,) bias ONCE (off the
    per-call critical path) into a lane-dense (F, n_pad) / (1, n_pad) layout."""
    n_classes, features = weight.shape
    n_pad = _round_up(max(n_classes, 1), LANE)
    wt = (
        jnp.zeros((features, n_pad), dtype=dtype)
        .at[:, :n_classes]
        .set(weight.T.astype(dtype))
    )
    b = jnp.zeros((1, n_pad), dtype=dtype).at[0, :n_classes].set(bias.astype(dtype))
    return wt, b


# -----------------------------------------------------------------------------
# Kernels
# -----------------------------------------------------------------------------
def _linear_kernel(x_ref, wt_ref, b_ref, o_ref):
    # x_ref: (TB, F)  wt_ref: (F, n_pad)  b_ref: (1, n_pad)  o_ref: (TB, n_pad)
    acc = jnp.dot(x_ref[...], wt_ref[...], preferred_element_type=jnp.float32)
    o_ref[...] = (acc + b_ref[...]).astype(o_ref.dtype)


def _linear_packed_kernel(x_ref, wt_ref, b_ref, o_ref):
    # n_classes == 1 path.
    # x_ref: (TB, F)  wt_ref: (F, 128)  b_ref: (1, 128)  o_ref: (TB//128, 128)
    acc = jnp.dot(x_ref[...], wt_ref[...], preferred_element_type=jnp.float32)
    acc = acc + b_ref[...]
    n_sub = o_ref.shape[0]  # static = TB // 128
    for j in range(n_sub):  # static unrolled loop (XLU transposes hide under DMA)
        blk = acc[j * LANE:(j + 1) * LANE, :]          # (128, 128) sub-block
        row = blk.T[0:1, :]                            # class-0 column -> lane-dense row
        o_ref[pl.ds(j, 1), :] = row.astype(o_ref.dtype)


# -----------------------------------------------------------------------------
# Forward
# -----------------------------------------------------------------------------
@functools.partial(jax.jit, static_argnames=("n_classes",))
def classifier_forward(x, wt_padded, b_padded, *, n_classes=N_CLASSES):
    """x: (B, F); wt_padded: (F, n_pad); b_padded: (1, n_pad) from prepare_classifier_params."""
    B, F = x.shape
    n_pad = wt_padded.shape[1]
    dtype = x.dtype
    itemsize = jnp.dtype(dtype).itemsize
    w_itemsize = jnp.dtype(wt_padded.dtype).itemsize

    # ---- packed path: single-class head, lane-dense output (no 128x write amp)
    if n_classes == 1 and B % LANE == 0:
        tb = _pick_tile(B, (MAX_TILE_B, 1024, 512, 256, 128))
        # Output block is (tb // 128, 128); its sublane dim must be a multiple
        # of 8 (i.e. tb % 1024 == 0) OR the single block must cover the whole
        # output array, to respect the (8, 128) rule.
        if tb is not None and (tb % (SUBLANE * LANE) == 0 or tb == B):
            n_tiles = B // tb
            n_sub = tb // LANE
            out_packed = pl.pallas_call(
                _linear_packed_kernel,
                out_shape=jax.ShapeDtypeStruct((B // LANE, LANE), dtype),
                grid_spec=pl.GridSpec(
                    grid=(n_tiles,),
                    in_specs=[
                        pl.BlockSpec((tb, F), lambda i: (i, 0)),
                        pl.BlockSpec((F, n_pad), lambda i: (0, 0)),   # resident
                        pl.BlockSpec((1, n_pad), lambda i: (0, 0)),   # resident
                    ],
                    out_specs=pl.BlockSpec((n_sub, LANE), lambda i: (i, 0)),
                ),
                compiler_params=pltpu.CompilerParams(
                    dimension_semantics=("parallel",),
                ),
                cost_estimate=pl.CostEstimate(
                    flops=2 * B * F * n_pad,
                    transcendentals=0,
                    bytes_accessed=B * F * itemsize
                    + F * n_pad * w_itemsize
                    + B * itemsize,
                ),
            )(x, wt_padded, b_padded)
            return out_packed.reshape(B, 1)

    # ---- general path: lane-padded output, sliced back down in the wrapper ----
    B8 = _round_up(B, SUBLANE)
    if B8 != B:
        x = jnp.pad(x, ((0, B8 - B), (0, 0)))  # tiny batches only

    def _fits(tb):
        # double-buffered x tile + double-buffered out tile + resident weight/bias
        vmem = (2 * tb * F * itemsize
                + 2 * tb * n_pad * itemsize
                + 2 * F * n_pad * w_itemsize
                + 2 * n_pad * w_itemsize)
        return vmem <= VMEM_BUDGET_BYTES

    tb = _pick_tile(B8, (MAX_TILE_B, 1024, 512, 256, 128, 64, 32, 16, 8), fits=_fits)
    if tb is None:  # pathological n_pad; fall back to the smallest legal tile
        tb = SUBLANE
    n_tiles = B8 // tb
    out_padded = pl.pallas_call(
        _linear_kernel,
        out_shape=jax.ShapeDtypeStruct((B8, n_pad), dtype),
        grid_spec=pl.GridSpec(
            grid=(n_tiles,),
            in_specs=[
                pl.BlockSpec((tb, F), lambda i: (i, 0)),
                pl.BlockSpec((F, n_pad), lambda i: (0, 0)),   # resident
                pl.BlockSpec((1, n_pad), lambda i: (0, 0)),   # resident
            ],
            out_specs=pl.BlockSpec((tb, n_pad), lambda i: (i, 0)),
        ),
        compiler_params=pltpu.CompilerParams(
            dimension_semantics=("parallel",),
        ),
        cost_estimate=pl.CostEstimate(
            flops=2 * B8 * F * n_pad,
            transcendentals=0,
            bytes_accessed=B8 * F * itemsize
            + F * n_pad * w_itemsize
            + B8 * n_pad * itemsize,
        ),
    )(x, wt_padded, b_padded)
    return out_padded[:B, :n_classes]


if __name__ == "__main__":
    key = jax.random.PRNGKey(0)
    kx, kp, kx2, kp3 = jax.random.split(key, 4)

    # --- small shape matching the module default (n_classes=1, F=256) --------
    batch = 8
    x = jax.random.normal(kx, (batch, FEATURES_SIZE), dtype=jnp.float32)
    weight, bias = init_classifier_params(kp)
    wt_p, b_p = prepare_classifier_params(weight, bias)

    out = jax.block_until_ready(classifier_forward(x, wt_p, b_p, n_classes=N_CLASSES))
    ref = x @ weight.T + bias
    assert out.shape == (batch, N_CLASSES), out.shape
    assert jnp.allclose(out, ref, atol=1e-5, rtol=1e-5), "small-batch mismatch"

    # --- larger batch: exercises tiled/pipelined, packed lane-dense output ----
    batch2 = 4096
    x2 = jax.random.normal(kx2, (batch2, FEATURES_SIZE), dtype=jnp.float32)
    out2 = jax.block_until_ready(classifier_forward(x2, wt_p, b_p, n_classes=N_CLASSES))
    ref2 = x2 @ weight.T + bias
    assert out2.shape == (batch2, N_CLASSES), out2.shape
    assert jnp.allclose(out2, ref2, atol=1e-4, rtol=1e-4), "large-batch mismatch"

    # --- multi-class head: exercises the general lane-padded path -------------
    n_cls3 = 3
    w3, b3 = init_classifier_params(kp3, n_classes=n_cls3)
    wt3_p, b3_p = prepare_classifier_params(w3, b3)
    out3 = jax.block_until_ready(classifier_forward(x, wt3_p, b3_p, n_classes=n_cls3))
    ref3 = x @ w3.T + b3
    assert out3.shape == (batch, n_cls3), out3.shape
    assert jnp.allclose(out3, ref3, atol=1e-5, rtol=1e-5), "multi-class mismatch"

    print("KERNEL_OK")
</pallas_src>

<mosaic_0001>
module attributes {stable_mosaic.version = 11 : i64} {
  func.func @_linear_kernel(%arg0: i32, %arg1: memref<8x256xf32, #tpu.memory_space<vmem>>, %arg2: memref<256x128xf32, #tpu.memory_space<vmem>>, %arg3: memref<1x128xf32, #tpu.memory_space<vmem>>, %arg4: memref<8x128xf32, #tpu.memory_space<vmem>>) attributes {dimension_semantics = [#tpu.dimension_semantics<parallel>], iteration_bounds = array<i64: 1>, scalar_prefetch = 0 : i64, scratch_operands = 0 : i64, tpu.core_type = #tpu.core_type<tc>, window_params = [{transform_indices = @transform_0, window_bounds = array<i64: 8, 256>}, {pipeline_mode = #tpu.pipeline_mode<synchronous>, transform_indices = @transform_1, window_bounds = array<i64: 256, 128>}, {pipeline_mode = #tpu.pipeline_mode<synchronous>, transform_indices = @transform_2, window_bounds = array<i64: 1, 128>}, {transform_indices = @transform_3, window_bounds = array<i64: 8, 128>}]} {
    %c0 = arith.constant 0 : index
    %c0_0 = arith.constant 0 : index
    %0 = vector.load %arg1[%c0, %c0_0] : memref<8x256xf32, #tpu.memory_space<vmem>>, vector<8x256xf32>
    %c0_1 = arith.constant 0 : index
    %c0_2 = arith.constant 0 : index
    %1 = vector.load %arg2[%c0_1, %c0_2] : memref<256x128xf32, #tpu.memory_space<vmem>>, vector<256x128xf32>
    %cst = arith.constant dense<0.000000e+00> : vector<8x128xf32>
    %2 = tpu.matmul %0, %1, %cst {dimension_numbers = #tpu.dot_dimension_numbers<[1], [0], [0], [1], [0, 0, 1, 1], [], []>} : vector<8x256xf32>, vector<256x128xf32>, vector<8x128xf32> -> vector<8x128xf32>
    %c0_3 = arith.constant 0 : index
    %c0_4 = arith.constant 0 : index
    %3 = vector.load %arg3[%c0_3, %c0_4] : memref<1x128xf32, #tpu.memory_space<vmem>>, vector<1x128xf32>
    %4 = vector.broadcast %3 : vector<1x128xf32> to vector<8x128xf32>
    %5 = arith.addf %2, %4 : vector<8x128xf32>
    %c0_5 = arith.constant 0 : index
    %c0_6 = arith.constant 0 : index
    %6 = vector.load %arg4[%c0_5, %c0_6] : memref<8x128xf32, #tpu.memory_space<vmem>>, vector<8x128xf32>
    tpu.vector_store %arg4[%c0_5, %c0_6], %5 {strides = array<i32>} : memref<8x128xf32, #tpu.memory_space<vmem>>, vector<8x128xf32>,
    return
  }
  func.func @transform_0(%arg0: i32) -> (i32, i32) {
    %c0_i32 = arith.constant 0 : i32
    %c0_i32_0 = arith.constant 0 : i32
    return %arg0, %c0_i32 : i32, i32
  }
  func.func @transform_1(%arg0: i32) -> (i32, i32) {
    %c0_i32 = arith.constant 0 : i32
    %c0_i32_0 = arith.constant 0 : i32
    %c0_i32_1 = arith.constant 0 : i32
    return %c0_i32, %c0_i32_0 : i32, i32
  }
  func.func @transform_2(%arg0: i32) -> (i32, i32) {
    %c0_i32 = arith.constant 0 : i32
    %c0_i32_0 = arith.constant 0 : i32
    %c0_i32_1 = arith.constant 0 : i32
    return %c0_i32, %c0_i32_0 : i32, i32
  }
  func.func @transform_3(%arg0: i32) -> (i32, i32) {
    %c0_i32 = arith.constant 0 : i32
    %c0_i32_0 = arith.constant 0 : i32
    return %arg0, %c0_i32 : i32, i32
  }
}

</mosaic_0001>

<bundles_post_ra>
// kernel: classifier_forward.1
= control target key start
LH: loop header
LB: loop body
LE: loop exit
PB: predicated region body
PF: predicated region fallthrough
CT: control target
= control target key end

     0   :  { %8 = vsyncpa [#allocation3], 0  ;;  %s222_s0 = inlined_call_operand.hbm [shape: f32[8,256], index: 0, kind: input, shape index: {}]   ;;  %s223_s1 = inlined_call_operand.hbm [shape: f32[256,128], index: 1, kind: input, shape index: {}]   ;;  %s224_s2 = inlined_call_operand.vmem [shape: f32[1,128], index: 2, kind: input, shape index: {}]   ;;  %s225_s3 = inlined_call_operand.vmem [shape: f32[8,128], index: 3, kind: output, shape index: {}]  }
   0x1   :  { %s15_s14 = sshll.u32 %s222_s0, 4  ;;  %s16_s14 = int_to_ptr.hbm [resolvable:$true] %s15_s14 }
   0x2   :  { %9 = vsyncpa [#allocation5], 0  ;;  %s186_s15 = smov [#allocation2]   ;;  %s25_s19 = sshll.u32 %s223_s1, 4  ;;  %s26_s19 = int_to_ptr.hbm [resolvable:$true] %s25_s19 }
   0x3   :  { %s17_s16 = sshll.u32 %s186_s15, 4  ;;  %s187_s20 = smov [#allocation4]   ;;  %s18_s16 = int_to_ptr.vmem [resolvable:$true] %s17_s16 }
   0x4   :  { %20 = dma.hbm_to_vmem [thread:$0]  %s16_s14, 256, %s18_s16, [#allocation3]  }
   0x5   :  { %s27_s21 = sshll.u32 %s187_s20, 4  ;;  %s188_s22 = smov 128   ;;  %s28_s21 = int_to_ptr.vmem [resolvable:$true] %s27_s21 }
   0x6   :  { %s189_s23 = smov 8  }
   0x7   :  { %33 = dma.hbm_to_vmem [thread:$0]  %s26_s19, 4096, %s28_s21, [#allocation5], %s188_s22, %s188_s22, %s189_s23  }
   0x8   :  { %182 = dma.done.wait [#allocation3], 256  }
   0x9   :  { %183 = vsyncadd [#allocation3], 4294967040 }
   0xa   :  { %184 = dma.done.wait [#allocation5], 4096  }
   0xb   :  { %185 = vsyncadd [#allocation5], 4294963200  ;;  %v61_v0 = vld [vmem:[#allocation4 + $0x78] sm:$0xff]  ;;  %v60_v1 = vld [vmem:[#allocation4 + $0x70] sm:$0xff] }
   0xc   :  { %v77_v2 = vld [vmem:[#allocation4 + $0xf8] sm:$0xff]  ;;  %82 = vmatpush.msra.mxu0 %v61_v0  ;;  %v76_v3 = vld [vmem:[#allocation4 + $0xf0] sm:$0xff]  ;;  %v59_v4 = vld [vmem:[#allocation4 + $0x68] sm:$0xff] }
   0xd   :  { %102 = vmatpush.msra.mxu1 %v77_v2  ;;  %v75_v5 = vld [vmem:[#allocation4 + $0xe8] sm:$0xff]  ;;  %v58_v6 = vld [vmem:[#allocation4 + $0x60] sm:$0xff]  ;;  %v57_v8 = vld [vmem:[#allocation4 + $0x58] sm:$0xff] }
   0xe   :  { %83 = vmatpush.msra.mxu0 %v60_v1  ;;  %v74_v7 = vld [vmem:[#allocation4 + $0xe0] sm:$0xff]  ;;  %v73_v9 = vld [vmem:[#allocation4 + $0xd8] sm:$0xff]  ;;  %v56_v10 = vld [vmem:[#allocation4 + $0x50] sm:$0xff] }
   0xf   :  { %103 = vmatpush.msra.mxu1 %v76_v3  ;;  %v72_v11 = vld [vmem:[#allocation4 + $0xd0] sm:$0xff]  ;;  %v55_v12 = vld [vmem:[#allocation4 + $0x48] sm:$0xff]  ;;  %v54_v14 = vld [vmem:[#allocation4 + $0x40] sm:$0xff] }
  0x10   :  { %84 = vmatpush.msra.mxu0 %v59_v4  ;;  %v71_v13 = vld [vmem:[#allocation4 + $0xc8] sm:$0xff]  ;;  %v70_v15 = vld [vmem:[#allocation4 + $0xc0] sm:$0xff]  ;;  %v53_v16 = vld [vmem:[#allocation4 + $0x38] sm:$0xff] }
  0x11   :  { %104 = vmatpush.msra.mxu1 %v75_v5  ;;  %v69_v17 = vld [vmem:[#allocation4 + $0xb8] sm:$0xff]  ;;  %v52_v18 = vld [vmem:[#allocation4 + $0x30] sm:$0xff]  ;;  %v51_v20 = vld [vmem:[#allocation4 + $0x28] sm:$0xff] }
  0x12   :  { %85 = vmatpush.msra.mxu0 %v58_v6  ;;  %v68_v19 = vld [vmem:[#allocation4 + $0xb0] sm:$0xff]  ;;  %v67_v21 = vld [vmem:[#allocation4 + $0xa8] sm:$0xff]  ;;  %v50_v22 = vld [vmem:[#allocation4 + $0x20] sm:$0xff] }
  0x13   :  { %105 = vmatpush.msra.mxu1 %v74_v7  ;;  %v66_v23 = vld [vmem:[#allocation4 + $0xa0] sm:$0xff]  ;;  %v49_v24 = vld [vmem:[#allocation4 + $0x18] sm:$0xff]  ;;  %v48_v26 = vld [vmem:[#allocation4 + $0x10] sm:$0xff] }
  0x14   :  { %86 = vmatpush.msra.mxu0 %v57_v8  ;;  %v65_v25 = vld [vmem:[#allocation4 + $0x98] sm:$0xff]  ;;  %v64_v27 = vld [vmem:[#allocation4 + $0x90] sm:$0xff]  ;;  %v47_v28 = vld [vmem:[#allocation4 + $0x8] sm:$0xff] }
  0x15   :  { %106 = vmatpush.msra.mxu1 %v73_v9  ;;  %v63_v29 = vld [vmem:[#allocation4 + $0x88] sm:$0xff]  ;;  %v46_v30 = vld [vmem:[#allocation4] sm:$0xff]  ;;  %v44_v32 = vld [vmem:[#allocation2] sm:$0xff] }
  0x16   :  { %87 = vmatpush.msra.mxu0 %v56_v10  ;;  %v62_v31 = vld [vmem:[#allocation4 + $0x80] sm:$0xff]  ;;  %v45_v33 = vld [vmem:[#allocation2 + $0x8] sm:$0xff]  ;;  %v133_v34 = vld [vmem:[%s224_s2] ss:$0 sm:$0xff] }
  0x17   :  { %107 = vmatpush.msra.mxu1 %v72_v11 }
  0x18   :  { %88 = vmatpush.msra.mxu0 %v55_v12 }
  0x19   :  { %108 = vmatpush.msra.mxu1 %v71_v13 }
  0x1a   :  { %89 = vmatpush.msra.mxu0 %v54_v14 }
  0x1b   :  { %109 = vmatpush.msra.mxu1 %v70_v15 }
  0x1c   :  { %90 = vmatpush.msra.mxu0 %v53_v16 }
  0x1d   :  { %110 = vmatpush.msra.mxu1 %v69_v17 }
  0x1e   :  { %91 = vmatpush.msra.mxu0 %v52_v18 }
  0x1f   :  { %111 = vmatpush.msra.mxu1 %v68_v19 }
  0x20   :  { %92 = vmatpush.msra.mxu0 %v51_v20 }
  0x21   :  { %112 = vmatpush.msra.mxu1 %v67_v21 }
  0x22   :  { %93 = vmatpush.msra.mxu0 %v50_v22 }
  0x23   :  { %113 = vmatpush.msra.mxu1 %v66_v23 }
  0x24   :  { %94 = vmatpush.msra.mxu0 %v49_v24 }
  0x25   :  { %114 = vmatpush.msra.mxu1 %v65_v25 }
  0x26   :  { %95 = vmatpush.msra.mxu0 %v48_v26 }
  0x27   :  { %115 = vmatpush.msra.mxu1 %v64_v27 }
  0x28   :  { %96 = vmatpush.msra.mxu0 %v47_v28 }
  0x29   :  { %116 = vmatpush.msra.mxu1 %v63_v29 }
  0x2a   :  { %97 = vmatpush.msra.mxu0 %v46_v30 }
  0x2b   :  { %117 = vmatpush.msra.mxu1 %v62_v31  ;;  %98 = vmatmul.f32.vlgmr.msra.gmra.mxu0 %v44_v32 }
  0x2c   :  { %118 = vmatmul.f32.vlgmr.msra.gmra.mxu1 %v45_v33 }
  0xa8   :  { %v99_v35 = vpop.f32.mrf.mxu0 }
  0xa9   :  { %v119_v36 = vpop.f32.mrf.mxu1  ;;  %v100_v37 = vadd.f32 %v133_v34, %v99_v35 }
  0xab   :  { %v120_v38 = vadd.f32 %v119_v36, %v100_v37 }
  0xad   :  { %122 = vst [vmem:[%s225_s3] sm:$0xff] %v120_v38 }
  0xae   :  { %127 = vsyncpa [#allocation3], 1 }
  0xaf   :  { %128 = vsyncpa [#allocation5], 1 }

</bundles_post_ra>
